<compile_context>
chip_gen: v6e
topology: v6e:2x2x1
jax: 0.10.0
libtpu: 0.0.40
codegen_flags: <defaults>
</compile_context>

<pallas_src>
import functools
import math

import jax
import jax.numpy as jnp
from jax.experimental import pallas as pl
from jax.experimental.pallas import tpu as pltpu

_ALIGN = 16  # row-tile granularity: native sublane tiling for bf16 streams


def _round_up(v, m):
    return (v + m - 1) // m * m


def _vmem_budgets():
    """Chip-aware VMEM budgeting (v7x: 64 MiB/TC, v5e/v6e: 128 MiB)."""
    try:
        cap = int(pltpu.get_tpu_info().vmem_capacity_bytes)
    except Exception:
        cap = 64 * 1024 * 1024  # conservative fallback = v7x per-TC VMEM
    budget = int(cap * 0.40)                      # tile working-set budget
    limit = min(int(cap * 0.60), 96 * 1024 * 1024)  # scoped limit for Mosaic
    return budget, limit


def _choose_tm(rows, hp, stream_bytes_per_row, budget_bytes):
    """Row-tile size: biggest that fits the budget, then capped for grid steps."""
    rows_a = _round_up(max(rows, _ALIGN), _ALIGN)
    tm = min(1024, rows_a)
    # Double-buffered streams + (still double-buffered) resident weights/vectors.
    resident = 2 * 2 * hp * hp * 2 + 2 * 5 * hp * 4
    while tm > _ALIGN and 2 * tm * stream_bytes_per_row + resident > budget_bytes:
        tm = max(_ALIGN, _round_up(tm // 2, _ALIGN))
    # >= 2 grid steps so v7x's second TensorCore gets work.
    if rows_a >= 2 * _ALIGN:
        tm = min(tm, max(_ALIGN, (rows_a // 2) // _ALIGN * _ALIGN))
    # ~8 steps for DMA overlap once tiles can stay >= 256 rows (MXU M fill).
    if rows_a >= 8 * 256:
        tm = min(tm, max(256, (rows_a // 8) // _ALIGN * _ALIGN))
    return tm


def s4_block_kernel(x_ref, yc_ref, d_ref, g_ref, bln_ref,
                    w1_ref, b1_ref, w2_ref, b2_ref, o_ref, *, h_real):
    x = x_ref[...].astype(jnp.float32)               # (TM, Hp)
    hp = x.shape[-1]

    # ---- S4D output = causal conv (precomputed via FFT, streamed bf16) + D*u
    y = yc_ref[...].astype(jnp.float32) + x * d_ref[...]

    # ---- LayerNorm over the real H channels (padded lanes of y are zero).
    inv_h = 1.0 / float(h_real)
    mean = jnp.sum(y, axis=-1, keepdims=True) * inv_h
    centered = y - mean
    if h_real != hp:                                 # mask padded lanes
        lane = jax.lax.broadcasted_iota(jnp.int32, (1, hp), 1)
        centered = jnp.where(lane < h_real, centered, 0.0)
    var = jnp.sum(centered * centered, axis=-1, keepdims=True) * inv_h
    h = centered * jax.lax.rsqrt(var + 1e-5)
    h = h * g_ref[...] + bln_ref[...]                # gamma/beta padded with zeros

    # ---- Linear -> ReLU -> Linear -> ReLU (bf16 MXU inputs, f32 accumulate)
    h = jnp.dot(h.astype(jnp.bfloat16), w1_ref[...],
                preferred_element_type=jnp.float32) + b1_ref[...]
    h = jnp.maximum(h, 0.0)
    h = jnp.dot(h.astype(jnp.bfloat16), w2_ref[...],
                preferred_element_type=jnp.float32) + b2_ref[...]
    h = jnp.maximum(h, 0.0)

    # TODO(synk): nn.Dropout(p=0.5) is identity in eval mode; training-mode
    # dropout (pltpu.prng_random_bits mask + 1/(1-p) scale) is not implemented.
    o_ref[...] = (x + h).astype(o_ref.dtype)         # residual, stored in x.dtype


def preprocess_params(params, L):
    """One-time preprocessing hoisted off the forward path."""
    kt, D, gamma, beta, w1, b1, w2, b2 = params
    H = kt.shape[1]
    Hp = _round_up(H, 128)   # keep 128-alignment: kernel is HBM-bound, extra
    n = 2 * L                # bytes for 256-alignment would not pay off.
    kf = jnp.fft.rfft(kt.astype(jnp.float32), n=n, axis=0)      # (n//2+1, H)

    def pad_vec(v):
        return jnp.pad(v.astype(jnp.float32), (0, Hp - H)).reshape(1, Hp)

    def pad_mat(w):
        return jnp.pad(w.astype(jnp.float32),
                       ((0, Hp - H), (0, Hp - H))).astype(jnp.bfloat16)

    return dict(H=H, Hp=Hp, L=L, n=n, kf=kf,
                d=pad_vec(D), gamma=pad_vec(gamma), beta=pad_vec(beta),
                w1=pad_mat(w1), b1=pad_vec(b1), w2=pad_mat(w2), b2=pad_vec(b2))


def s4_block_forward(x, prep):
    B, L, H = x.shape
    assert H == prep["H"] and L == prep["L"]
    Hp, n = prep["Hp"], prep["n"]

    # ---- S4D causal depthwise conv via FFT (plain JAX, O(L log L)).
    xf = jnp.fft.rfft(x.astype(jnp.float32), n=n, axis=1)
    yconv = jnp.fft.irfft(xf * prep["kf"][None], n=n, axis=1)[:, :L, :]

    rows = B * L
    out_dtype = x.dtype
    x_b = jnp.dtype(x.dtype).itemsize
    o_b = jnp.dtype(out_dtype).itemsize
    budget, vmem_limit = _vmem_budgets()
    stream_bytes_per_row = Hp * (x_b + 2 + o_b)      # x + yconv(bf16) + out
    TM = _choose_tm(rows, Hp, stream_bytes_per_row, budget)
    rows_p = _round_up(rows, TM)
    needs_pad = (rows_p != rows) or (Hp != H)

    def stream(a, dtype):
        a = a.reshape(rows, H)
        if a.dtype != dtype:
            a = a.astype(dtype)
        if needs_pad:
            a = jnp.pad(a, ((0, rows_p - rows), (0, Hp - H)))
        return a

    x2 = stream(x, x.dtype)            # residual stays in the caller's dtype
    y2 = stream(yconv, jnp.bfloat16)   # conv output streamed at half the bytes

    row_spec = pl.BlockSpec((TM, Hp), lambda i: (i, 0))
    vec_spec = pl.BlockSpec((1, Hp), lambda i: (0, 0))
    mat_spec = pl.BlockSpec((Hp, Hp), lambda i: (0, 0))

    cost = pl.CostEstimate(
        flops=4 * rows_p * Hp * Hp + 10 * rows_p * Hp,
        transcendentals=rows_p,
        bytes_accessed=rows_p * Hp * (x_b + 2 + o_b) + 2 * Hp * Hp * 2 + 5 * Hp * 4,
    )

    out = pl.pallas_call(
        functools.partial(s4_block_kernel, h_real=H),
        out_shape=jax.ShapeDtypeStruct((rows_p, Hp), out_dtype),
        grid=(rows_p // TM,),
        in_specs=[row_spec, row_spec, vec_spec, vec_spec, vec_spec,
                  mat_spec, vec_spec, mat_spec, vec_spec],
        out_specs=row_spec,
        compiler_params=pltpu.CompilerParams(
            dimension_semantics=("parallel",),
            vmem_limit_bytes=vmem_limit),
        cost_estimate=cost,
    )(x2, y2, prep["d"], prep["gamma"], prep["beta"],
      prep["w1"], prep["b1"], prep["w2"], prep["b2"])

    if needs_pad:
        out = out[:rows, :H]
    return out.reshape(B, L, H)


def init_params(key, H, N, L):
    """Deterministic synthetic parameters matching S4DLayer/LayerNorm/Linear shapes."""
    ks = jax.random.split(key, 8)
    # --- S4D parameters (S4D-Lin init)
    dt_min, dt_max = 1e-3, 1e-1
    log_dt = math.log(dt_min) + jax.random.uniform(ks[0], (H,)) * (
        math.log(dt_max) - math.log(dt_min))
    log_A_real = jnp.log(0.5 * jnp.ones((H, N // 2)))
    A_imag = math.pi * jnp.broadcast_to(
        jnp.arange(N // 2, dtype=jnp.float32), (H, N // 2))
    C = (jax.random.normal(ks[1], (H, N // 2))
         + 1j * jax.random.normal(ks[2], (H, N // 2))) * (0.5 ** 0.5)
    D = jax.random.normal(ks[3], (H,))

    # Discretize & materialize the length-L convolution kernel (plain-JAX glue).
    dt = jnp.exp(log_dt)
    A = -jnp.exp(log_A_real) + 1j * A_imag           # (H, N/2)
    dtA = A * dt[:, None]
    Kpow = jnp.exp(dtA[:, :, None] * jnp.arange(L))  # (H, N/2, L)
    Ct = C * (jnp.exp(dtA) - 1.0) / A
    K = 2.0 * jnp.real(jnp.einsum('hn,hnl->hl', Ct, Kpow))   # (H, L)
    kt = jnp.asarray(K.T, dtype=jnp.float32)                 # (L, H)

    # --- LayerNorm
    gamma = jnp.ones((H,), jnp.float32)
    beta = jnp.zeros((H,), jnp.float32)

    # --- Linear layers (torch default init), stored pre-transposed (h @ W^T == h @ w).
    bound = 1.0 / math.sqrt(H)
    w1 = jax.random.uniform(ks[4], (H, H), minval=-bound, maxval=bound)
    b1 = jax.random.uniform(ks[5], (H,), minval=-bound, maxval=bound)
    w2 = jax.random.uniform(ks[6], (H, H), minval=-bound, maxval=bound)
    b2 = jax.random.uniform(ks[7], (H,), minval=-bound, maxval=bound)
    return (kt, D.astype(jnp.float32), gamma, beta,
            w1.astype(jnp.float32), b1.astype(jnp.float32),
            w2.astype(jnp.float32), b2.astype(jnp.float32))


def ref_forward(x, kt, D, gamma, beta, w1, b1, w2, b2):
    """Pure-JAX reference (direct causal conv; same bf16-input matmul numerics)."""
    B, L, H = x.shape
    y = x * D[None, None, :]
    for j in range(L):
        shifted = jnp.pad(x[:, : L - j, :], ((0, 0), (j, 0), (0, 0)))
        y = y + shifted * kt[j][None, None, :]
    mean = y.mean(-1, keepdims=True)
    var = ((y - mean) ** 2).mean(-1, keepdims=True)
    h = (y - mean) / jnp.sqrt(var + 1e-5) * gamma + beta
    h = jnp.maximum(jnp.dot(h.astype(jnp.bfloat16), w1.astype(jnp.bfloat16),
                            preferred_element_type=jnp.float32) + b1, 0.0)
    h = jnp.maximum(jnp.dot(h.astype(jnp.bfloat16), w2.astype(jnp.bfloat16),
                            preferred_element_type=jnp.float32) + b2, 0.0)
    return x + h


if __name__ == "__main__":
    B, L, H, N = 2, 8, 32, 16
    key = jax.random.PRNGKey(0)
    kx, kp = jax.random.split(key)
    x = jax.random.normal(kx, (B, L, H), dtype=jnp.float32)
    params = init_params(kp, H, N, L)
    prep = preprocess_params(params, L)   # one-time, off the forward path

    out = jax.block_until_ready(s4_block_forward(x, prep))

    ref = ref_forward(x, *params)
    assert out.shape == (B, L, H)
    err = float(jnp.max(jnp.abs(out.astype(jnp.float32) - ref)))
    assert err < 2e-2, f"mismatch vs reference: {err}"
    print("KERNEL_OK")
</pallas_src>

<mosaic_0001>
module attributes {stable_mosaic.version = 11 : i64} {
  func.func @s4_block_kernel(%arg0: i32, %arg1: memref<16x128xf32, #tpu.memory_space<vmem>>, %arg2: memref<16x128xbf16, #tpu.memory_space<vmem>>, %arg3: memref<1x128xf32, #tpu.memory_space<vmem>>, %arg4: memref<1x128xf32, #tpu.memory_space<vmem>>, %arg5: memref<1x128xf32, #tpu.memory_space<vmem>>, %arg6: memref<128x128xbf16, #tpu.memory_space<vmem>>, %arg7: memref<1x128xf32, #tpu.memory_space<vmem>>, %arg8: memref<128x128xbf16, #tpu.memory_space<vmem>>, %arg9: memref<1x128xf32, #tpu.memory_space<vmem>>, %arg10: memref<16x128xf32, #tpu.memory_space<vmem>>) attributes {dimension_semantics = [#tpu.dimension_semantics<parallel>], iteration_bounds = array<i64: 1>, scalar_prefetch = 0 : i64, scratch_operands = 0 : i64, tpu.core_type = #tpu.core_type<tc>, window_params = [{transform_indices = @transform_0, window_bounds = array<i64: 16, 128>}, {transform_indices = @transform_1, window_bounds = array<i64: 16, 128>}, {pipeline_mode = #tpu.pipeline_mode<synchronous>, transform_indices = @transform_2, window_bounds = array<i64: 1, 128>}, {pipeline_mode = #tpu.pipeline_mode<synchronous>, transform_indices = @transform_3, window_bounds = array<i64: 1, 128>}, {pipeline_mode = #tpu.pipeline_mode<synchronous>, transform_indices = @transform_4, window_bounds = array<i64: 1, 128>}, {pipeline_mode = #tpu.pipeline_mode<synchronous>, transform_indices = @transform_5, window_bounds = array<i64: 128, 128>}, {pipeline_mode = #tpu.pipeline_mode<synchronous>, transform_indices = @transform_6, window_bounds = array<i64: 1, 128>}, {pipeline_mode = #tpu.pipeline_mode<synchronous>, transform_indices = @transform_7, window_bounds = array<i64: 128, 128>}, {pipeline_mode = #tpu.pipeline_mode<synchronous>, transform_indices = @transform_8, window_bounds = array<i64: 1, 128>}, {transform_indices = @transform_9, window_bounds = array<i64: 16, 128>}]} {
    %c0 = arith.constant 0 : index
    %c0_0 = arith.constant 0 : index
    %0 = vector.load %arg1[%c0, %c0_0] : memref<16x128xf32, #tpu.memory_space<vmem>>, vector<16x128xf32>
    %c0_1 = arith.constant 0 : index
    %c0_2 = arith.constant 0 : index
    %1 = vector.load %arg2[%c0_1, %c0_2] : memref<16x128xbf16, #tpu.memory_space<vmem>>, vector<16x128xbf16>
    %2 = arith.extf %1 : vector<16x128xbf16> to vector<16x128xf32>
    %c0_3 = arith.constant 0 : index
    %c0_4 = arith.constant 0 : index
    %3 = vector.load %arg3[%c0_3, %c0_4] : memref<1x128xf32, #tpu.memory_space<vmem>>, vector<1x128xf32>
    %4 = vector.broadcast %3 : vector<1x128xf32> to vector<16x128xf32>
    %5 = arith.mulf %0, %4 : vector<16x128xf32>
    %6 = arith.addf %2, %5 : vector<16x128xf32>
    %cst = arith.constant dense<0.000000e+00> : vector<16xf32>
    %7 = vector.multi_reduction <add>, %6, %cst [1] : vector<16x128xf32> to vector<16xf32>
    %8 = vector.shape_cast %7 : vector<16xf32> to vector<16x1xf32>
    %cst_5 = arith.constant 3.125000e-02 : f32
    %9 = vector.broadcast %cst_5 : f32 to vector<16x1xf32>
    %10 = arith.mulf %8, %9 : vector<16x1xf32>
    %11 = vector.broadcast %10 : vector<16x1xf32> to vector<16x128xf32>
    %12 = arith.subf %6, %11 : vector<16x128xf32>
    %13 = tpu.iota {dimensions = array<i32: 1>} : vector<1x128xi32>
    %c32_i32 = arith.constant 32 : i32
    %14 = vector.broadcast %c32_i32 : i32 to vector<1x128xi32>
    %15 = arith.cmpi slt, %13, %14 : vector<1x128xi32>
    %cst_6 = arith.constant 0.000000e+00 : f32
    %16 = vector.shape_cast %15 : vector<1x128xi1> to vector<1x128xi1>
    %17 = vector.broadcast %16 : vector<1x128xi1> to vector<16x128xi1>
    %18 = vector.broadcast %cst_6 : f32 to vector<16x128xf32>
    %19 = arith.select %17, %12, %18 : vector<16x128xi1>, vector<16x128xf32>
    %20 = arith.mulf %19, %19 : vector<16x128xf32>
    %cst_7 = arith.constant dense<0.000000e+00> : vector<16xf32>
    %21 = vector.multi_reduction <add>, %20, %cst_7 [1] : vector<16x128xf32> to vector<16xf32>
    %22 = vector.shape_cast %21 : vector<16xf32> to vector<16x1xf32>
    %cst_8 = arith.constant 3.125000e-02 : f32
    %23 = vector.broadcast %cst_8 : f32 to vector<16x1xf32>
    %24 = arith.mulf %22, %23 : vector<16x1xf32>
    %cst_9 = arith.constant 9.99999974E-6 : f32
    %25 = vector.broadcast %cst_9 : f32 to vector<16x1xf32>
    %26 = arith.addf %24, %25 : vector<16x1xf32>
    %27 = math.rsqrt %26 : vector<16x1xf32>
    %28 = vector.broadcast %27 : vector<16x1xf32> to vector<16x128xf32>
    %29 = arith.mulf %19, %28 : vector<16x128xf32>
    %c0_10 = arith.constant 0 : index
    %c0_11 = arith.constant 0 : index
    %30 = vector.load %arg4[%c0_10, %c0_11] : memref<1x128xf32, #tpu.memory_space<vmem>>, vector<1x128xf32>
    %31 = vector.broadcast %30 : vector<1x128xf32> to vector<16x128xf32>
    %32 = arith.mulf %29, %31 : vector<16x128xf32>
    %c0_12 = arith.constant 0 : index
    %c0_13 = arith.constant 0 : index
    %33 = vector.load %arg5[%c0_12, %c0_13] : memref<1x128xf32, #tpu.memory_space<vmem>>, vector<1x128xf32>
    %34 = vector.broadcast %33 : vector<1x128xf32> to vector<16x128xf32>
    %35 = arith.addf %32, %34 : vector<16x128xf32>
    %36 = arith.truncf %35 : vector<16x128xf32> to vector<16x128xbf16>
    %c0_14 = arith.constant 0 : index
    %c0_15 = arith.constant 0 : index
    %37 = vector.load %arg6[%c0_14, %c0_15] : memref<128x128xbf16, #tpu.memory_space<vmem>>, vector<128x128xbf16>
    %cst_16 = arith.constant dense<0.000000e+00> : vector<16x128xf32>
    %38 = tpu.matmul %36, %37, %cst_16 {dimension_numbers = #tpu.dot_dimension_numbers<[1], [0], [0], [1], [0, 0, 1, 1], [], []>} : vector<16x128xbf16>, vector<128x128xbf16>, vector<16x128xf32> -> vector<16x128xf32>
    %c0_17 = arith.constant 0 : index
    %c0_18 = arith.constant 0 : index
    %39 = vector.load %arg7[%c0_17, %c0_18] : memref<1x128xf32, #tpu.memory_space<vmem>>, vector<1x128xf32>
    %40 = vector.broadcast %39 : vector<1x128xf32> to vector<16x128xf32>
    %41 = arith.addf %38, %40 : vector<16x128xf32>
    %cst_19 = arith.constant 0.000000e+00 : f32
    %42 = vector.broadcast %cst_19 : f32 to vector<16x128xf32>
    %43 = arith.maximumf %41, %42 : vector<16x128xf32>
    %44 = arith.truncf %43 : vector<16x128xf32> to vector<16x128xbf16>
    %c0_20 = arith.constant 0 : index
    %c0_21 = arith.constant 0 : index
    %45 = vector.load %arg8[%c0_20, %c0_21] : memref<128x128xbf16, #tpu.memory_space<vmem>>, vector<128x128xbf16>
    %cst_22 = arith.constant dense<0.000000e+00> : vector<16x128xf32>
    %46 = tpu.matmul %44, %45, %cst_22 {dimension_numbers = #tpu.dot_dimension_numbers<[1], [0], [0], [1], [0, 0, 1, 1], [], []>} : vector<16x128xbf16>, vector<128x128xbf16>, vector<16x128xf32> -> vector<16x128xf32>
    %c0_23 = arith.constant 0 : index
    %c0_24 = arith.constant 0 : index
    %47 = vector.load %arg9[%c0_23, %c0_24] : memref<1x128xf32, #tpu.memory_space<vmem>>, vector<1x128xf32>
    %48 = vector.broadcast %47 : vector<1x128xf32> to vector<16x128xf32>
    %49 = arith.addf %46, %48 : vector<16x128xf32>
    %cst_25 = arith.constant 0.000000e+00 : f32
    %50 = vector.broadcast %cst_25 : f32 to vector<16x128xf32>
    %51 = arith.maximumf %49, %50 : vector<16x128xf32>
    %52 = arith.addf %0, %51 : vector<16x128xf32>
    %c0_26 = arith.constant 0 : index
    %c0_27 = arith.constant 0 : index
    %53 = vector.load %arg10[%c0_26, %c0_27] : memref<16x128xf32, #tpu.memory_space<vmem>>, vector<16x128xf32>
    tpu.vector_store %arg10[%c0_26, %c0_27], %52 {strides = array<i32>} : memref<16x128xf32, #tpu.memory_space<vmem>>, vector<16x128xf32>,
    return
  }
  func.func @transform_0(%arg0: i32) -> (i32, i32) {
    %c0_i32 = arith.constant 0 : i32
    %c0_i32_0 = arith.constant 0 : i32
    return %arg0, %c0_i32 : i32, i32
  }
  func.func @transform_1(%arg0: i32) -> (i32, i32) {
    %c0_i32 = arith.constant 0 : i32
    %c0_i32_0 = arith.constant 0 : i32
    return %arg0, %c0_i32 : i32, i32
  }
  func.func @transform_2(%arg0: i32) -> (i32, i32) {
    %c0_i32 = arith.constant 0 : i32
    %c0_i32_0 = arith.constant 0 : i32
    %c0_i32_1 = arith.constant 0 : i32
    return %c0_i32, %c0_i32_0 : i32, i32
  }
  func.func @transform_3(%arg0: i32) -> (i32, i32) {
    %c0_i32 = arith.constant 0 : i32
    %c0_i32_0 = arith.constant 0 : i32
    %c0_i32_1 = arith.constant 0 : i32
    return %c0_i32, %c0_i32_0 : i32, i32
  }
  func.func @transform_4(%arg0: i32) -> (i32, i32) {
    %c0_i32 = arith.constant 0 : i32
    %c0_i32_0 = arith.constant 0 : i32
    %c0_i32_1 = arith.constant 0 : i32
    return %c0_i32, %c0_i32_0 : i32, i32
  }
  func.func @transform_5(%arg0: i32) -> (i32, i32) {
    %c0_i32 = arith.constant 0 : i32
    %c0_i32_0 = arith.constant 0 : i32
    %c0_i32_1 = arith.constant 0 : i32
    return %c0_i32, %c0_i32_0 : i32, i32
  }
  func.func @transform_6(%arg0: i32) -> (i32, i32) {
    %c0_i32 = arith.constant 0 : i32
    %c0_i32_0 = arith.constant 0 : i32
    %c0_i32_1 = arith.constant 0 : i32
    return %c0_i32, %c0_i32_0 : i32, i32
  }
  func.func @transform_7(%arg0: i32) -> (i32, i32) {
    %c0_i32 = arith.constant 0 : i32
    %c0_i32_0 = arith.constant 0 : i32
    %c0_i32_1 = arith.constant 0 : i32
    return %c0_i32, %c0_i32_0 : i32, i32
  }
  func.func @transform_8(%arg0: i32) -> (i32, i32) {
    %c0_i32 = arith.constant 0 : i32
    %c0_i32_0 = arith.constant 0 : i32
    %c0_i32_1 = arith.constant 0 : i32
    return %c0_i32, %c0_i32_0 : i32, i32
  }
  func.func @transform_9(%arg0: i32) -> (i32, i32) {
    %c0_i32 = arith.constant 0 : i32
    %c0_i32_0 = arith.constant 0 : i32
    return %arg0, %c0_i32 : i32, i32
  }
}

</mosaic_0001>

<bundles_post_ra>
// kernel: tpu_custom_call.1
= control target key start
LH: loop header
LB: loop body
LE: loop exit
PB: predicated region body
PF: predicated region fallthrough
CT: control target
= control target key end

     0   :  { %14 = vsyncpa [#allocation3], 0  ;;  %s760_s0 = inlined_call_operand.hbm [shape: f32[16,128], index: 0, kind: input, shape index: {}]   ;;  %s761_s1 = inlined_call_operand.hbm [shape: bf16[16,128], index: 1, kind: input, shape index: {}]   ;;  %s762_s2 = inlined_call_operand.vmem [shape: f32[1,128], index: 2, kind: input, shape index: {}]   ;;  %s763_s3 = inlined_call_operand.vmem [shape: f32[1,128], index: 3, kind: input, shape index: {}]   ;;  %s764_s4 = inlined_call_operand.vmem [shape: f32[1,128], index: 4, kind: input, shape index: {}]   ;;  %s765_s5 = inlined_call_operand.hbm [shape: bf16[128,128], index: 5, kind: input, shape index: {}]   ;;  %s766_s6 = inlined_call_operand.vmem [shape: f32[1,128], index: 6, kind: input, shape index: {}]   ;;  %s767_s7 = inlined_call_operand.hbm [shape: bf16[128,128], index: 7, kind: input, shape index: {}]   ;;  %s768_s8 = inlined_call_operand.vmem [shape: f32[1,128], index: 8, kind: input, shape index: {}]   ;;  %s769_s9 = inlined_call_operand.hbm [shape: f32[16,128], index: 9, kind: output, shape index: {}]  }
   0x1   :  { %15 = vsyncpa [#allocation6], 0 }
   0x2   :  { %16 = vsyncpa [#allocation9], 0 }
   0x3   :  { %17 = vsyncpa [#allocation4], 0  ;;  %s628_s30 = smov [#allocation5]  }
   0x4   :  { %s35_s10 = sshll.u32 %s628_s30, 4  ;;  %s36_s10 = int_to_ptr.vmem [resolvable:$true] %s35_s10 }
   0x5   :  { %s528_s11 = scalar_lea.vmem %s36_s10, 128  ;;  %p533_p1 = scmp.lt.s32.totalorder %s36_s10, %s36_s10 }
   0x6   :  { %p529_p0 = scmp.ne.s32.totalorder %s36_s10, %s528_s11  ;;  %p534_p2 = scmp.lt.s32.totalorder %s528_s11, %s528_s11 }
   0x8   :  { %p535_p3 = por %p534_p2, %p533_p1 }
   0xa   :  { %p536_p4 = pnand %p535_p3, %p529_p0 }
   0xc   :  { %539 = shalt.err (!%p536_p4)
}
   0xd   :  { %s629_s12 = smov 64   ;;  %s630_s13 = smov 4  }
   0xe   :  { %41 = dma.hbm_to_vmem [thread:$0]  %s761_s1, 128, %s36_s10, [#allocation6], %s629_s12, %s629_s12, %s630_s13  }
   0xf   :  { %s631_s16 = smov [#allocation2]  }
  0x10   :  { %s23_s17 = sshll.u32 %s631_s16, 4  ;;  %s24_s17 = int_to_ptr.vmem [resolvable:$true] %s23_s17 }
  0x11   :  { %s548_s18 = scalar_lea.vmem %s24_s17, 256  ;;  %p553_p6 = scmp.lt.s32.totalorder %s24_s17, %s24_s17 }
  0x12   :  { %p549_p5 = scmp.ne.s32.totalorder %s24_s17, %s548_s18  ;;  %p554_p7 = scmp.lt.s32.totalorder %s548_s18, %s548_s18 }
  0x14   :  { %p555_p8 = por %p554_p7, %p553_p6 }
  0x16   :  { %p556_p9 = pnand %p555_p8, %p549_p5 }
  0x18   :  { %559 = shalt.err (!%p556_p9)
}
  0x19   :  { %s632_s19 = smov 128   ;;  %s633_s20 = smov 8  }
  0x1a   :  { %29 = dma.hbm_to_vmem [thread:$0]  %s760_s0, 256, %s24_s17, [#allocation3], %s632_s19, %s632_s19, %s633_s20  }
  0x1b   :  { %s634_s1 = smov [#allocation7]   ;;  %s635_s24 = smov [#allocation8]  }
  0x1c   :  { %s53_s23 = sshll.u32 %s634_s1, 4  ;;  %s67_s25 = sshll.u32 %s635_s24, 4  ;;  %s54_s23 = int_to_ptr.vmem [resolvable:$true] %s53_s23  ;;  %s68_s25 = int_to_ptr.vmem [resolvable:$true] %s67_s25 }
  0x1d   :  { %s568_s26 = scalar_lea.vmem %s54_s23, 1024  ;;  %p573_p11 = scmp.lt.s32.totalorder %s54_s23, %s54_s23 }
  0x1e   :  { %p569_p10 = scmp.ne.s32.totalorder %s54_s23, %s568_s26  ;;  %p574_p12 = scmp.lt.s32.totalorder %s568_s26, %s568_s26 }
  0x20   :  { %p575_p13 = por %p574_p12, %p573_p11 }
  0x22   :  { %p576_p0 = pnand %p575_p13, %p569_p10 }
  0x24   :  { %579 = shalt.err (!%p576_p0)
}
  0x25   :  { %59 = dma.hbm_to_vmem [thread:$0]  %s765_s5, 1024, %s54_s23, [#allocation6], %s629_s12, %s629_s12, %s630_s13  }
  0x26   :  { %s588_s0 = scalar_lea.vmem %s68_s25, 1024  ;;  %p593_p2 = scmp.lt.s32.totalorder %s68_s25, %s68_s25 }
  0x27   :  { %p589_p1 = scmp.ne.s32.totalorder %s68_s25, %s588_s0  ;;  %p594_p3 = scmp.lt.s32.totalorder %s588_s0, %s588_s0 }
  0x29   :  { %p595_p4 = por %p594_p3, %p593_p2 }
  0x2b   :  { %p596_p5 = pnand %p595_p4, %p589_p1 }
  0x2d   :  { %599 = shalt.err (!%p596_p5)
}
  0x2e   :  { %73 = dma.hbm_to_vmem [thread:$0]  %s767_s7, 1024, %s68_s25, [#allocation9], %s629_s12, %s629_s12, %s630_s13  }
  0x2f   :  { %620 = dma.done.wait [#allocation3], 256  }
  0x30   :  { %621 = vsyncadd [#allocation3], 4294967040 }
  0x31   :  { %622 = dma.done.wait [#allocation6], 1152  }
  0x32   :  { %623 = vsyncadd [#allocation6], 4294966144 }
  0x33   :  { %624 = dma.done.wait [#allocation9], 1024  }
  0x34   :  { %625 = vsyncadd [#allocation9], 4294966272  ;;  %v713_v0 = vld [vmem:[#allocation2] sm:$0xff]  ;;  %v428_v1 = vld [vmem:[#allocation5] sm:$0xff]   ;;  %v636_v11 = vmov 0.0   ;;  %v114_v12 = vlaneseq  ;;  %vm637_vm1 = vmmov 0  }
  0x35   :  { %v406_v2 = vld [vmem:[%s762_s2] ss:$0 sm:$0xff]  ;;  %v429_v3 = vunpack.c.l.bf16 %v428_v1  ;;  %v719_v5 = vld [vmem:[#allocation2 + $0x8] sm:$0xff]  ;;  %v430_v6 = vunpack.c.h.bf16 %v428_v1  ;;  %v500_v10 = vld [vmem:[#allocation7 + $0x38] sm:$0xff]   ;;  %449 = vmatprep.subr.bf16.mxu0 %v636_v11  ;;  %469 = vmatprep.subr.bf16.mxu1 %v636_v11 }
  0x36   :  { %v102_v4 = vmul.f32 %v406_v2, %v713_v0  ;;  %v103_v7 = vmul.f32 %v406_v2, %v719_v5  ;;  %450 = vmatpush3.bf16.msra.mxu0 %v500_v10  ;;  %v115_v13 = vand.u32 127, %v114_v12  ;;  %v501_v24 = vld [vmem:[#allocation7 + $0x30] sm:$0xff]   ;;  %v502_v25 = vld [vmem:[#allocation7 + $0x28] sm:$0xff]   ;;  %v503_v26 = vld [vmem:[#allocation7 + $0x20] sm:$0xff]   ;;  %465 = vmatprep.mubr.msk.bf16.mxu0 %vm637_vm1, %v636_v11 }
  0x37   :  { %451 = vmatprep.subr.bf16.mxu0 %v636_v11  ;;  %485 = vmatprep.mubr.msk.bf16.mxu1 %vm637_vm1, %v636_v11  ;;  %v504_v27 = vld [vmem:[#allocation7 + $0x18] sm:$0xff]   ;;  %v505_v28 = vld [vmem:[#allocation7 + $0x10] sm:$0xff]   ;;  %v506_v29 = vld [vmem:[#allocation7 + $0x8] sm:$0xff]  }
  0x38   :  { %v104_v8 = vadd.f32 %v429_v3, %v102_v4  ;;  %v105_v9 = vadd.f32 %v430_v6, %v103_v7  ;;  %vm116_vm0 = vcmp.lt.s32.totalorder %v115_v13, 32  ;;  %v507_v30 = vld [vmem:[#allocation7] sm:$0xff]   ;;  %v508_v31 = vld [vmem:[#allocation8 + $0x38] sm:$0xff]   ;;  %v509_v32 = vld [vmem:[#allocation8 + $0x30] sm:$0xff]  }
  0x39   :  { %470 = vmatpush3.bf16.msra.mxu1 %v508_v31  ;;  %v510_v33 = vld [vmem:[#allocation8 + $0x28] sm:$0xff]   ;;  %v511_v34 = vld [vmem:[#allocation8 + $0x20] sm:$0xff]   ;;  %v512_v35 = vld [vmem:[#allocation8 + $0x18] sm:$0xff]  }
  0x3a   :  { %106 = vadd.xlane.f32.xlu0 %v104_v8  ;;  %452 = vmatpush3.bf16.msra.mxu0 %v501_v24  ;;  %v407_v44 = vld [vmem:[%s763_s3] ss:$0 sm:$0xff]  ;;  %v513_v53 = vld [vmem:[#allocation8 + $0x10] sm:$0xff]   ;;  %v515_v55 = vld [vmem:[#allocation8] sm:$0xff]  }
  0x3b   :  { %453 = vmatprep.subr.bf16.mxu0 %v636_v11  ;;  %471 = vmatprep.subr.bf16.mxu1 %v636_v11  ;;  %v408_v48 = vld [vmem:[%s764_s4] ss:$0 sm:$0xff] }
  0x3c   :  { %v514_v54 = vld [vmem:[#allocation8 + $0x8] sm:$0xff]  }
  0x3d   :  { %472 = vmatpush3.bf16.msra.mxu1 %v509_v32  ;;  %v409_v56 = vld [vmem:[%s766_s6] ss:$0 sm:$0xff]  ;;  %s638_s6 = smov [#allocation10]  }
  0x3e   :  { %108 = vadd.xlane.f32.xlu0 %v105_v9  ;;  %454 = vmatpush3.bf16.msra.mxu0 %v502_v25  ;;  %v418_v3 = vld [vmem:[%s768_s8] ss:$0 sm:$0xff]  ;;  %s392_s15 = sshll.u32 %s638_s6, 4  ;;  %s393_s15 = int_to_ptr.vmem [resolvable:$true] %s392_s15 }
  0x3f   :  { %455 = vmatprep.subr.bf16.mxu0 %v636_v11  ;;  %473 = vmatprep.subr.bf16.mxu1 %v636_v11  ;;  %s600_s16 = scalar_lea.vmem %s393_s15, 256  ;;  %p605_p7 = scmp.lt.s32.totalorder %s393_s15, %s393_s15 }
  0x40   :  { %p601_p6 = scmp.ne.s32.totalorder %s393_s15, %s600_s16  ;;  %p606_p8 = scmp.lt.s32.totalorder %s600_s16, %s600_s16 }
  0x41   :  { %474 = vmatpush3.bf16.msra.mxu1 %v510_v33 }
  0x42   :  { %456 = vmatpush3.bf16.msra.mxu0 %v503_v26  ;;  %475 = vmatprep.subr.bf16.mxu1 %v636_v11  ;;  %p607_p9 = por %p606_p8, %p605_p7 }
  0x43   :  { %457 = vmatprep.subr.bf16.mxu0 %v636_v11 }
  0x44   :  { %p608_p10 = pnand %p607_p9, %p601_p6 }
  0x45   :  { %476 = vmatpush3.bf16.msra.mxu1 %v511_v34 }
  0x46   :  { %458 = vmatpush3.bf16.msra.mxu0 %v504_v27  ;;  %477 = vmatprep.subr.bf16.mxu1 %v636_v11 }
  0x47   :  { %459 = vmatprep.subr.bf16.mxu0 %v636_v11 }
  0x49   :  { %478 = vmatpush3.bf16.msra.mxu1 %v512_v35 }
  0x4a   :  { %460 = vmatpush3.bf16.msra.mxu0 %v505_v28  ;;  %479 = vmatprep.subr.bf16.mxu1 %v636_v11 }
  0x4b   :  { %461 = vmatprep.subr.bf16.mxu0 %v636_v11 }
  0x4d   :  { %480 = vmatpush3.bf16.msra.mxu1 %v513_v53 }
  0x4e   :  { %462 = vmatpush3.bf16.msra.mxu0 %v506_v29  ;;  %481 = vmatprep.subr.bf16.mxu1 %v636_v11 }
  0x4f   :  { %463 = vmatprep.subr.bf16.mxu0 %v636_v11 }
  0x51   :  { %482 = vmatpush3.bf16.msra.mxu1 %v514_v54 }
  0x52   :  { %464 = vmatpush3.bf16.msra.mxu0 %v507_v30  ;;  %483 = vmatprep.subr.bf16.mxu1 %v636_v11 }
  0x55   :  { %484 = vmatpush3.bf16.msra.mxu1 %v515_v55 }
  0xc3   :  { %v107_v14 = vpop.xlane.xlu0 %106 }
  0xc4   :  { %v110_v15 = vmul.f32 0.03125, %v107_v14 }
  0xc6   :  { %v112_v16 = vsub.f32 %v104_v8, %v110_v15 }
  0xc7   :  { %v109_v17 = vpop.xlane.xlu0 %108 }
  0xc8   :  { %v111_v18 = vmul.f32 0.03125, %v109_v17  ;;  %v119_v19 = vsel %vm116_vm0, %v112_v16, 0.0 }
  0xc9   :  { %v121_v20 = vmul.f32 %v119_v19, %v119_v19 }
  0xca   :  { %v113_v21 = vsub.f32 %v105_v9, %v111_v18 }
  0xcb   :  { %123 = vadd.xlane.f32.xlu1 %v121_v20 }
  0xcc   :  { %v120_v22 = vsel %vm116_vm0, %v113_v21, 0.0 }
  0xcd   :  { %v122_v23 = vmul.f32 %v120_v22, %v120_v22 }
  0xcf   :  { %125 = vadd.xlane.f32.xlu1 %v122_v23 }
 0x154   :  { %v124_v36 = vpop.xlane.xlu1 %123 }
 0x155   :  { %v127_v37 = vmul.f32 0.03125, %v124_v36 }
 0x157   :  { %v129_v38 = vadd.f32 1e-05, %v127_v37 }
 0x158   :  { %v126_v39 = vpop.xlane.xlu1 %125 }
 0x159   :  { %516 = vrsqrt.f32 %v129_v38  ;;  %v128_v40 = vmul.f32 0.03125, %v126_v39 }
 0x15b   :  { %v130_v41 = vadd.f32 1e-05, %v128_v40 }
 0x15d   :  { %518 = vrsqrt.f32 %v130_v41 }
 0x166   :  { %v517_v42 = vpop.eup %516 }
 0x167   :  { %v133_v43 = vmul.f32 %v517_v42, %v119_v19 }
 0x169   :  { %v142_v47 = vmul.f32 %v407_v44, %v133_v43 }
 0x16a   :  { %v519_v45 = vpop.eup %518 }
 0x16b   :  { %v134_v46 = vmul.f32 %v519_v45, %v120_v22  ;;  %v151_v50 = vadd.f32 %v408_v48, %v142_v47 }
 0x16d   :  { %v143_v49 = vmul.f32 %v407_v44, %v134_v46 }
 0x16f   :  { %v152_v51 = vadd.f32 %v408_v48, %v143_v49 }
 0x171   :  { %v153_v52 = vpack.c.bf16 %v152_v51, %v151_v50 }
 0x173   :  { %466 = vmatmul.mubr.bf16.vlgmr.msra.gmra.mxu0 %v153_v52 }
 0x233   :  { %v259_v57 = vpop.f32.mrf.mxu0 }
 0x234   :  { %v260_v59 = vadd.f32 %v409_v56, %v259_v57 }
 0x235   :  { %v467_v58 = vpop.f32.mrf.mxu0 }
 0x236   :  { %v266_v63 = vmax.f32 %v260_v59, 0.0 }
 0x237   :  { %v262_v60 = vpop.f32.mrf.mxu0 }
 0x238   :  { %v263_v61 = vadd.f32 %v409_v56, %v262_v60 }
 0x239   :  { %v468_v62 = vpop.f32.mrf.mxu0 }
 0x23a   :  { %v267_v1 = vmax.f32 %v263_v61, 0.0 }
 0x23c   :  { %v268_v2 = vpack.c.bf16 %v267_v1, %v266_v63 }
 0x23e   :  { %486 = vmatmul.mubr.bf16.vlgmr.msra.gmra.mxu1 %v268_v2 }
 0x2fe   :  { %v374_v4 = vpop.f32.mrf.mxu1 }
 0x2ff   :  { %v375_v6 = vadd.f32 %v418_v3, %v374_v4 }
 0x300   :  { %v487_v7 = vpop.f32.mrf.mxu1 }
 0x301   :  { %v381_v8 = vmax.f32 %v375_v6, 0.0 }
 0x302   :  { %v377_v9 = vpop.f32.mrf.mxu1 }
 0x303   :  { %v383_v10 = vadd.f32 %v381_v8, %v713_v0  ;;  %v378_v11 = vadd.f32 %v418_v3, %v377_v9 }
 0x304   :  { %v488_v12 = vpop.f32.mrf.mxu1 }
 0x305   :  { %385 = vst [vmem:[#allocation10] sm:$0xff] %v383_v10  ;;  %v382_v13 = vmax.f32 %v378_v11, 0.0 }
 0x307   :  { %v384_v14 = vadd.f32 %v382_v13, %v719_v5 }
 0x309   :  { %386 = vst [vmem:[#allocation10 + $0x8] sm:$0xff] %v384_v14 }
 0x30a   :  { %611 = shalt.err (!%p608_p10)
}
 0x30b   :  { %398 = dma.vmem_to_hbm [thread:$0]  %s393_s15, 256, %s769_s9, [#allocation4], %s632_s19, %s632_s19, %s633_s20  }
 0x30c   :  { %626 = dma.done.wait [#allocation4], 256  }
 0x30d   :  { %627 = vsyncadd [#allocation4], 4294967040 }
 0x30e   :  { %402 = vsyncpa [#allocation3], 1 }
 0x30f   :  { %403 = vsyncpa [#allocation6], 1 }
 0x310   :  { %404 = vsyncpa [#allocation9], 1 }
 0x311   :  { %405 = vsyncpa [#allocation4], 1 }

</bundles_post_ra>
